<compile_context>
chip_gen: v5e
topology: v5e:2x2
jax: 0.10.0
libtpu: 0.0.40
codegen_flags: <defaults>
</compile_context>

<pallas_src>
import functools

import numpy as np
import jax
import jax.numpy as jnp
from jax import lax
from jax.experimental import pallas as pl
from jax.experimental.pallas import tpu as pltpu

LANE = 128     # lane width: pad every operator's output dim to a multiple
TILE_B = 8     # batch rows per grid step (sublane-aligned)


def _round_up(x, m):
    return ((x + m - 1) // m) * m


# ----------------------------------------------------------------------------
# Fused Pallas kernel:  x -> [ @ W_l + b_l -> act_l ]  for l = 1..6  -> out
# ----------------------------------------------------------------------------
def _fused_autoencoder_kernel(x_ref, *refs, acts):
    out_ref = refs[-1]
    wb_refs = refs[:-1]                       # (w1, b1, w2, b2, ..., wL, bL)
    h = x_ref[...].astype(jnp.bfloat16)       # bf16 MXU inputs
    n_layers = len(acts)
    for l in range(n_layers):                 # Python-unrolled (static)
        w_ref = wb_refs[2 * l]
        b_ref = wb_refs[2 * l + 1]
        acc = jnp.dot(h, w_ref[...], preferred_element_type=jnp.float32)
        acc = acc + b_ref[...]                # f32 bias add (v5e-safe)
        act = acts[l]
        if act == "relu":
            acc = jnp.maximum(acc, 0.0)
        elif act == "sigmoid":
            acc = 1.0 / (1.0 + jnp.exp(-acc))  # f32 EUP exp + divide
        # "none": passthrough
        if l + 1 < n_layers:
            h = acc.astype(jnp.bfloat16)       # next layer's MXU input
        else:
            out_ref[...] = acc.astype(out_ref.dtype)


def fused_autoencoder(x_flat, mats, biases, acts):
    bp, k_in = x_flat.shape
    n_out = mats[-1].shape[1]
    grid = (pl.cdiv(bp, TILE_B),)

    in_specs = [pl.BlockSpec((TILE_B, k_in), lambda i: (i, 0))]
    args = [x_flat]
    for w, b in zip(mats, biases):
        # Full-array blocks with constant index_map: weights/biases are DMA'd
        # once and stay resident in VMEM across all grid steps.
        in_specs.append(pl.BlockSpec(w.shape, lambda i: (0, 0)))
        in_specs.append(pl.BlockSpec(b.shape, lambda i: (0, 0)))
        args += [w, b]

    kernel = functools.partial(_fused_autoencoder_kernel, acts=tuple(acts))
    return pl.pallas_call(
        kernel,
        out_shape=jax.ShapeDtypeStruct((bp, n_out), jnp.float32),
        grid=grid,
        in_specs=in_specs,
        out_specs=pl.BlockSpec((TILE_B, n_out), lambda i: (i, 0)),
        compiler_params=pltpu.CompilerParams(
            dimension_semantics=("parallel",),        # batch tiles -> both TCs
            vmem_limit_bytes=32 * 1024 * 1024,
        ),
    )(*args)


# ----------------------------------------------------------------------------
# Host-side (init-time) lowering of conv / transposed conv to dense operators.
# y_flat = x_flat @ A + b_flat, with NHWC (h, w, c) row-major flattening.
# ----------------------------------------------------------------------------
def _conv2d_operator(w_oihw, h_in, w_in, stride, padding):
    w = np.asarray(w_oihw, dtype=np.float32)
    c_out, c_in, kh, kw = w.shape
    h_out = (h_in + 2 * padding - kh) // stride + 1
    w_out = (w_in + 2 * padding - kw) // stride + 1
    A = np.zeros((h_in * w_in * c_in, h_out * w_out * c_out), np.float32)
    for oh in range(h_out):
        for ow in range(w_out):
            c0 = (oh * w_out + ow) * c_out
            for di in range(kh):
                ih = oh * stride + di - padding
                if not (0 <= ih < h_in):
                    continue
                for dj in range(kw):
                    iw = ow * stride + dj - padding
                    if not (0 <= iw < w_in):
                        continue
                    r0 = (ih * w_in + iw) * c_in
                    A[r0:r0 + c_in, c0:c0 + c_out] += w[:, :, di, dj].T
    return A, h_out, w_out


def _conv_transpose2d_operator(w_iohw, h_in, w_in, stride, padding, output_padding):
    w = np.asarray(w_iohw, dtype=np.float32)
    c_in, c_out, kh, kw = w.shape
    h_out = (h_in - 1) * stride - 2 * padding + kh + output_padding
    w_out = (w_in - 1) * stride - 2 * padding + kw + output_padding
    A = np.zeros((h_in * w_in * c_in, h_out * w_out * c_out), np.float32)
    for ih in range(h_in):
        for iw in range(w_in):
            r0 = (ih * w_in + iw) * c_in
            for di in range(kh):
                oh = ih * stride - padding + di
                if not (0 <= oh < h_out):
                    continue
                for dj in range(kw):
                    ow = iw * stride - padding + dj
                    if not (0 <= ow < w_out):
                        continue
                    c0 = (oh * w_out + ow) * c_out
                    A[r0:r0 + c_in, c0:c0 + c_out] += w[:, :, di, dj]
    return A, h_out, w_out


def prepare_dense_params(params, img_res, use_sigmoid=True):
    """Lower every layer to a lane-padded dense operator + flattened bias."""
    mats, biases, acts = [], [], []
    h = w = img_res
    true_in = img_res * img_res * 1            # C_in = 1
    pad_in = _round_up(true_in, LANE)

    layer_defs = [("conv", wgt, b, "relu") for (wgt, b) in params["enc"]]
    n_dec = len(params["dec"])
    for li, (wgt, b) in enumerate(params["dec"]):
        last = li == n_dec - 1
        act = ("sigmoid" if use_sigmoid else "none") if last else "relu"
        layer_defs.append(("deconv", wgt, b, act))

    for kind, wgt, b, act in layer_defs:
        if kind == "conv":
            A, h, w = _conv2d_operator(wgt, h, w, stride=2, padding=1)
        else:
            A, h, w = _conv_transpose2d_operator(wgt, h, w, stride=2, padding=1,
                                                 output_padding=1)
        b_flat = np.tile(np.asarray(b, np.float32), h * w)   # (h,w,c) order
        true_out = A.shape[1]
        pad_out = _round_up(true_out, LANE)
        A_pad = np.zeros((pad_in, pad_out), np.float32)
        A_pad[:A.shape[0], :true_out] = A
        b_pad = np.zeros((1, pad_out), np.float32)
        b_pad[0, :true_out] = b_flat
        mats.append(jnp.asarray(A_pad, dtype=jnp.bfloat16))   # bf16 MXU weights
        biases.append(jnp.asarray(b_pad, dtype=jnp.float32))  # f32 bias
        acts.append(act)
        true_in, pad_in = true_out, pad_out

    return {"mats": mats, "biases": biases, "acts": acts,
            "img_res": img_res, "out_true": true_in}


# ----------------------------------------------------------------------------
# ComposedAutoEncoder forward (NCHW at the module boundary only)
# ----------------------------------------------------------------------------
def composed_autoencoder_forward(prepared, data_batch):
    img_res = prepared["img_res"]
    img_dim = img_res * img_res
    x = jnp.reshape(data_batch, (-1, img_dim)).astype(jnp.float32)  # C_in = 1
    batch = x.shape[0]
    bp = _round_up(batch, TILE_B)
    k_in = prepared["mats"][0].shape[0]
    x = jnp.pad(x, ((0, bp - batch), (0, k_in - img_dim)))
    y = fused_autoencoder(x, prepared["mats"], prepared["biases"], prepared["acts"])
    y = y[:batch, :prepared["out_true"]]
    return y.reshape(batch, 1, img_res, img_res)


# ----------------------------------------------------------------------------
# Parameter init (matches torch module structure: enc 1->4->8->16, dec 16->8->4->1)
# ----------------------------------------------------------------------------
def init_params(key, layers_channels=(4, 8, 16), in_channels=1):
    params = {"enc": [], "dec": []}
    k = 3
    prev = in_channels
    for c in layers_channels:                                  # Conv2d(prev->c)
        key, kw_, kb_ = jax.random.split(key, 3)
        scale = 1.0 / jnp.sqrt(prev * k * k)
        w = jax.random.normal(kw_, (c, prev, k, k), jnp.float32) * scale
        b = jax.random.normal(kb_, (c,), jnp.float32) * scale
        params["enc"].append((w, b))
        prev = c
    dec_channels = list(reversed(layers_channels))[1:] + [in_channels]
    for c in dec_channels:                                     # ConvTranspose2d(prev->c)
        key, kw_, kb_ = jax.random.split(key, 3)
        scale = 1.0 / jnp.sqrt(prev * k * k)
        w = jax.random.normal(kw_, (prev, c, k, k), jnp.float32) * scale  # (I,O,kh,kw)
        b = jax.random.normal(kb_, (c,), jnp.float32) * scale
        params["dec"].append((w, b))
        prev = c
    return params


# ----------------------------------------------------------------------------
# Pure-JAX reference (independent lowering via lax.conv_general_dilated)
# ----------------------------------------------------------------------------
def reference_forward(params, data_batch, img_res, use_sigmoid=True):
    x = jnp.reshape(data_batch, (-1, 1, img_res, img_res)).astype(jnp.float32)
    dn = ("NCHW", "OIHW", "NCHW")
    for (w, b) in params["enc"]:
        x = lax.conv_general_dilated(x, w, (2, 2), ((1, 1), (1, 1)),
                                     dimension_numbers=dn)
        x = jnp.maximum(x + b.reshape(1, -1, 1, 1), 0.0)
    n_dec = len(params["dec"])
    for li, (w, b) in enumerate(params["dec"]):
        w_conv = jnp.transpose(w[:, :, ::-1, ::-1], (1, 0, 2, 3))  # flip + swap I/O
        x = lax.conv_general_dilated(x, w_conv, (1, 1), ((1, 2), (1, 2)),
                                     lhs_dilation=(2, 2), dimension_numbers=dn)
        x = x + b.reshape(1, -1, 1, 1)
        if li < n_dec - 1:
            x = jnp.maximum(x, 0.0)
        elif use_sigmoid:
            x = 1.0 / (1.0 + jnp.exp(-x))
    return x


if __name__ == "__main__":
    key = jax.random.PRNGKey(0)
    k_param, k_data = jax.random.split(key)

    IMG_RES = 16
    BATCH = 2
    params = init_params(k_param, layers_channels=(4, 8, 16), in_channels=1)
    prepared = prepare_dense_params(params, IMG_RES, use_sigmoid=True)

    x = jax.random.normal(k_data, (BATCH, 1, IMG_RES, IMG_RES), jnp.float32)

    fwd = jax.jit(functools.partial(composed_autoencoder_forward, prepared))
    out = jax.block_until_ready(fwd(x))

    assert out.shape == (BATCH, 1, IMG_RES, IMG_RES), out.shape
    assert bool(jnp.all(jnp.isfinite(out)))
    assert bool(jnp.all((out >= 0.0) & (out <= 1.0)))       # sigmoid output

    # Correctness vs an independent pure-JAX lowering (bf16 MXU tolerance).
    ref = jax.block_until_ready(reference_forward(params, x, IMG_RES, True))
    max_err = float(jnp.max(jnp.abs(out - ref)))
    assert max_err < 5e-2, f"max abs error vs reference: {max_err}"

    print("KERNEL_OK")
</pallas_src>

<mosaic_0001>
module attributes {stable_mosaic.version = 11 : i64} {
  func.func @_fused_autoencoder_kernel(%arg0: i32, %arg1: memref<8x256xf32, #tpu.memory_space<vmem>>, %arg2: memref<256x256xbf16, #tpu.memory_space<vmem>>, %arg3: memref<1x256xf32, #tpu.memory_space<vmem>>, %arg4: memref<256x128xbf16, #tpu.memory_space<vmem>>, %arg5: memref<1x128xf32, #tpu.memory_space<vmem>>, %arg6: memref<128x128xbf16, #tpu.memory_space<vmem>>, %arg7: memref<1x128xf32, #tpu.memory_space<vmem>>, %arg8: memref<128x128xbf16, #tpu.memory_space<vmem>>, %arg9: memref<1x128xf32, #tpu.memory_space<vmem>>, %arg10: memref<128x256xbf16, #tpu.memory_space<vmem>>, %arg11: memref<1x256xf32, #tpu.memory_space<vmem>>, %arg12: memref<256x256xbf16, #tpu.memory_space<vmem>>, %arg13: memref<1x256xf32, #tpu.memory_space<vmem>>, %arg14: memref<8x256xf32, #tpu.memory_space<vmem>>) attributes {dimension_semantics = [#tpu.dimension_semantics<parallel>], iteration_bounds = array<i64: 1>, scalar_prefetch = 0 : i64, scratch_operands = 0 : i64, tpu.core_type = #tpu.core_type<tc>, window_params = [{transform_indices = @transform_0, window_bounds = array<i64: 8, 256>}, {pipeline_mode = #tpu.pipeline_mode<synchronous>, transform_indices = @transform_1, window_bounds = array<i64: 256, 256>}, {pipeline_mode = #tpu.pipeline_mode<synchronous>, transform_indices = @transform_2, window_bounds = array<i64: 1, 256>}, {pipeline_mode = #tpu.pipeline_mode<synchronous>, transform_indices = @transform_3, window_bounds = array<i64: 256, 128>}, {pipeline_mode = #tpu.pipeline_mode<synchronous>, transform_indices = @transform_4, window_bounds = array<i64: 1, 128>}, {pipeline_mode = #tpu.pipeline_mode<synchronous>, transform_indices = @transform_5, window_bounds = array<i64: 128, 128>}, {pipeline_mode = #tpu.pipeline_mode<synchronous>, transform_indices = @transform_6, window_bounds = array<i64: 1, 128>}, {pipeline_mode = #tpu.pipeline_mode<synchronous>, transform_indices = @transform_7, window_bounds = array<i64: 128, 128>}, {pipeline_mode = #tpu.pipeline_mode<synchronous>, transform_indices = @transform_8, window_bounds = array<i64: 1, 128>}, {pipeline_mode = #tpu.pipeline_mode<synchronous>, transform_indices = @transform_9, window_bounds = array<i64: 128, 256>}, {pipeline_mode = #tpu.pipeline_mode<synchronous>, transform_indices = @transform_10, window_bounds = array<i64: 1, 256>}, {pipeline_mode = #tpu.pipeline_mode<synchronous>, transform_indices = @transform_11, window_bounds = array<i64: 256, 256>}, {pipeline_mode = #tpu.pipeline_mode<synchronous>, transform_indices = @transform_12, window_bounds = array<i64: 1, 256>}, {transform_indices = @transform_13, window_bounds = array<i64: 8, 256>}]} {
    %c0 = arith.constant 0 : index
    %c0_0 = arith.constant 0 : index
    %0 = vector.load %arg1[%c0, %c0_0] : memref<8x256xf32, #tpu.memory_space<vmem>>, vector<8x256xf32>
    %1 = arith.truncf %0 : vector<8x256xf32> to vector<8x256xbf16>
    %c0_1 = arith.constant 0 : index
    %c0_2 = arith.constant 0 : index
    %2 = vector.load %arg2[%c0_1, %c0_2] : memref<256x256xbf16, #tpu.memory_space<vmem>>, vector<256x256xbf16>
    %cst = arith.constant dense<0.000000e+00> : vector<8x256xf32>
    %3 = tpu.matmul %1, %2, %cst {dimension_numbers = #tpu.dot_dimension_numbers<[1], [0], [0], [1], [0, 0, 1, 1], [], []>} : vector<8x256xbf16>, vector<256x256xbf16>, vector<8x256xf32> -> vector<8x256xf32>
    %c0_3 = arith.constant 0 : index
    %c0_4 = arith.constant 0 : index
    %4 = vector.load %arg3[%c0_3, %c0_4] : memref<1x256xf32, #tpu.memory_space<vmem>>, vector<1x256xf32>
    %5 = vector.broadcast %4 : vector<1x256xf32> to vector<8x256xf32>
    %6 = arith.addf %3, %5 : vector<8x256xf32>
    %cst_5 = arith.constant 0.000000e+00 : f32
    %7 = vector.broadcast %cst_5 : f32 to vector<8x256xf32>
    %8 = arith.maximumf %6, %7 : vector<8x256xf32>
    %9 = arith.truncf %8 : vector<8x256xf32> to vector<8x256xbf16>
    %c0_6 = arith.constant 0 : index
    %c0_7 = arith.constant 0 : index
    %10 = vector.load %arg4[%c0_6, %c0_7] : memref<256x128xbf16, #tpu.memory_space<vmem>>, vector<256x128xbf16>
    %cst_8 = arith.constant dense<0.000000e+00> : vector<8x128xf32>
    %11 = tpu.matmul %9, %10, %cst_8 {dimension_numbers = #tpu.dot_dimension_numbers<[1], [0], [0], [1], [0, 0, 1, 1], [], []>} : vector<8x256xbf16>, vector<256x128xbf16>, vector<8x128xf32> -> vector<8x128xf32>
    %c0_9 = arith.constant 0 : index
    %c0_10 = arith.constant 0 : index
    %12 = vector.load %arg5[%c0_9, %c0_10] : memref<1x128xf32, #tpu.memory_space<vmem>>, vector<1x128xf32>
    %13 = vector.broadcast %12 : vector<1x128xf32> to vector<8x128xf32>
    %14 = arith.addf %11, %13 : vector<8x128xf32>
    %cst_11 = arith.constant 0.000000e+00 : f32
    %15 = vector.broadcast %cst_11 : f32 to vector<8x128xf32>
    %16 = arith.maximumf %14, %15 : vector<8x128xf32>
    %17 = arith.truncf %16 : vector<8x128xf32> to vector<8x128xbf16>
    %c0_12 = arith.constant 0 : index
    %c0_13 = arith.constant 0 : index
    %18 = vector.load %arg6[%c0_12, %c0_13] : memref<128x128xbf16, #tpu.memory_space<vmem>>, vector<128x128xbf16>
    %cst_14 = arith.constant dense<0.000000e+00> : vector<8x128xf32>
    %19 = tpu.matmul %17, %18, %cst_14 {dimension_numbers = #tpu.dot_dimension_numbers<[1], [0], [0], [1], [0, 0, 1, 1], [], []>} : vector<8x128xbf16>, vector<128x128xbf16>, vector<8x128xf32> -> vector<8x128xf32>
    %c0_15 = arith.constant 0 : index
    %c0_16 = arith.constant 0 : index
    %20 = vector.load %arg7[%c0_15, %c0_16] : memref<1x128xf32, #tpu.memory_space<vmem>>, vector<1x128xf32>
    %21 = vector.broadcast %20 : vector<1x128xf32> to vector<8x128xf32>
    %22 = arith.addf %19, %21 : vector<8x128xf32>
    %cst_17 = arith.constant 0.000000e+00 : f32
    %23 = vector.broadcast %cst_17 : f32 to vector<8x128xf32>
    %24 = arith.maximumf %22, %23 : vector<8x128xf32>
    %25 = arith.truncf %24 : vector<8x128xf32> to vector<8x128xbf16>
    %c0_18 = arith.constant 0 : index
    %c0_19 = arith.constant 0 : index
    %26 = vector.load %arg8[%c0_18, %c0_19] : memref<128x128xbf16, #tpu.memory_space<vmem>>, vector<128x128xbf16>
    %cst_20 = arith.constant dense<0.000000e+00> : vector<8x128xf32>
    %27 = tpu.matmul %25, %26, %cst_20 {dimension_numbers = #tpu.dot_dimension_numbers<[1], [0], [0], [1], [0, 0, 1, 1], [], []>} : vector<8x128xbf16>, vector<128x128xbf16>, vector<8x128xf32> -> vector<8x128xf32>
    %c0_21 = arith.constant 0 : index
    %c0_22 = arith.constant 0 : index
    %28 = vector.load %arg9[%c0_21, %c0_22] : memref<1x128xf32, #tpu.memory_space<vmem>>, vector<1x128xf32>
    %29 = vector.broadcast %28 : vector<1x128xf32> to vector<8x128xf32>
    %30 = arith.addf %27, %29 : vector<8x128xf32>
    %cst_23 = arith.constant 0.000000e+00 : f32
    %31 = vector.broadcast %cst_23 : f32 to vector<8x128xf32>
    %32 = arith.maximumf %30, %31 : vector<8x128xf32>
    %33 = arith.truncf %32 : vector<8x128xf32> to vector<8x128xbf16>
    %c0_24 = arith.constant 0 : index
    %c0_25 = arith.constant 0 : index
    %34 = vector.load %arg10[%c0_24, %c0_25] : memref<128x256xbf16, #tpu.memory_space<vmem>>, vector<128x256xbf16>
    %cst_26 = arith.constant dense<0.000000e+00> : vector<8x256xf32>
    %35 = tpu.matmul %33, %34, %cst_26 {dimension_numbers = #tpu.dot_dimension_numbers<[1], [0], [0], [1], [0, 0, 1, 1], [], []>} : vector<8x128xbf16>, vector<128x256xbf16>, vector<8x256xf32> -> vector<8x256xf32>
    %c0_27 = arith.constant 0 : index
    %c0_28 = arith.constant 0 : index
    %36 = vector.load %arg11[%c0_27, %c0_28] : memref<1x256xf32, #tpu.memory_space<vmem>>, vector<1x256xf32>
    %37 = vector.broadcast %36 : vector<1x256xf32> to vector<8x256xf32>
    %38 = arith.addf %35, %37 : vector<8x256xf32>
    %cst_29 = arith.constant 0.000000e+00 : f32
    %39 = vector.broadcast %cst_29 : f32 to vector<8x256xf32>
    %40 = arith.maximumf %38, %39 : vector<8x256xf32>
    %41 = arith.truncf %40 : vector<8x256xf32> to vector<8x256xbf16>
    %c0_30 = arith.constant 0 : index
    %c0_31 = arith.constant 0 : index
    %42 = vector.load %arg12[%c0_30, %c0_31] : memref<256x256xbf16, #tpu.memory_space<vmem>>, vector<256x256xbf16>
    %cst_32 = arith.constant dense<0.000000e+00> : vector<8x256xf32>
    %43 = tpu.matmul %41, %42, %cst_32 {dimension_numbers = #tpu.dot_dimension_numbers<[1], [0], [0], [1], [0, 0, 1, 1], [], []>} : vector<8x256xbf16>, vector<256x256xbf16>, vector<8x256xf32> -> vector<8x256xf32>
    %c0_33 = arith.constant 0 : index
    %c0_34 = arith.constant 0 : index
    %44 = vector.load %arg13[%c0_33, %c0_34] : memref<1x256xf32, #tpu.memory_space<vmem>>, vector<1x256xf32>
    %45 = vector.broadcast %44 : vector<1x256xf32> to vector<8x256xf32>
    %46 = arith.addf %43, %45 : vector<8x256xf32>
    %cst_35 = arith.constant 0.000000e+00 : f32
    %47 = vector.broadcast %cst_35 : f32 to vector<8x256xf32>
    %48 = arith.subf %47, %46 : vector<8x256xf32>
    %49 = math.exp %48 : vector<8x256xf32>
    %cst_36 = arith.constant 1.000000e+00 : f32
    %50 = vector.broadcast %cst_36 : f32 to vector<8x256xf32>
    %51 = arith.addf %50, %49 : vector<8x256xf32>
    %cst_37 = arith.constant 1.000000e+00 : f32
    %52 = vector.broadcast %cst_37 : f32 to vector<8x256xf32>
    %53 = arith.divf %52, %51 : vector<8x256xf32>
    %c0_38 = arith.constant 0 : index
    %c0_39 = arith.constant 0 : index
    %54 = vector.load %arg14[%c0_38, %c0_39] : memref<8x256xf32, #tpu.memory_space<vmem>>, vector<8x256xf32>
    tpu.vector_store %arg14[%c0_38, %c0_39], %53 {strides = array<i32>} : memref<8x256xf32, #tpu.memory_space<vmem>>, vector<8x256xf32>,
    return
  }
  func.func @transform_0(%arg0: i32) -> (i32, i32) {
    %c0_i32 = arith.constant 0 : i32
    %c0_i32_0 = arith.constant 0 : i32
    return %arg0, %c0_i32 : i32, i32
  }
  func.func @transform_1(%arg0: i32) -> (i32, i32) {
    %c0_i32 = arith.constant 0 : i32
    %c0_i32_0 = arith.constant 0 : i32
    %c0_i32_1 = arith.constant 0 : i32
    return %c0_i32, %c0_i32_0 : i32, i32
  }
  func.func @transform_2(%arg0: i32) -> (i32, i32) {
    %c0_i32 = arith.constant 0 : i32
    %c0_i32_0 = arith.constant 0 : i32
    %c0_i32_1 = arith.constant 0 : i32
    return %c0_i32, %c0_i32_0 : i32, i32
  }
  func.func @transform_3(%arg0: i32) -> (i32, i32) {
    %c0_i32 = arith.constant 0 : i32
    %c0_i32_0 = arith.constant 0 : i32
    %c0_i32_1 = arith.constant 0 : i32
    return %c0_i32, %c0_i32_0 : i32, i32
  }
  func.func @transform_4(%arg0: i32) -> (i32, i32) {
    %c0_i32 = arith.constant 0 : i32
    %c0_i32_0 = arith.constant 0 : i32
    %c0_i32_1 = arith.constant 0 : i32
    return %c0_i32, %c0_i32_0 : i32, i32
  }
  func.func @transform_5(%arg0: i32) -> (i32, i32) {
    %c0_i32 = arith.constant 0 : i32
    %c0_i32_0 = arith.constant 0 : i32
    %c0_i32_1 = arith.constant 0 : i32
    return %c0_i32, %c0_i32_0 : i32, i32
  }
  func.func @transform_6(%arg0: i32) -> (i32, i32) {
    %c0_i32 = arith.constant 0 : i32
    %c0_i32_0 = arith.constant 0 : i32
    %c0_i32_1 = arith.constant 0 : i32
    return %c0_i32, %c0_i32_0 : i32, i32
  }
  func.func @transform_7(%arg0: i32) -> (i32, i32) {
    %c0_i32 = arith.constant 0 : i32
    %c0_i32_0 = arith.constant 0 : i32
    %c0_i32_1 = arith.constant 0 : i32
    return %c0_i32, %c0_i32_0 : i32, i32
  }
  func.func @transform_8(%arg0: i32) -> (i32, i32) {
    %c0_i32 = arith.constant 0 : i32
    %c0_i32_0 = arith.constant 0 : i32
    %c0_i32_1 = arith.constant 0 : i32
    return %c0_i32, %c0_i32_0 : i32, i32
  }
  func.func @transform_9(%arg0: i32) -> (i32, i32) {
    %c0_i32 = arith.constant 0 : i32
    %c0_i32_0 = arith.constant 0 : i32
    %c0_i32_1 = arith.constant 0 : i32
    return %c0_i32, %c0_i32_0 : i32, i32
  }
  func.func @transform_10(%arg0: i32) -> (i32, i32) {
    %c0_i32 = arith.constant 0 : i32
    %c0_i32_0 = arith.constant 0 : i32
    %c0_i32_1 = arith.constant 0 : i32
    return %c0_i32, %c0_i32_0 : i32, i32
  }
  func.func @transform_11(%arg0: i32) -> (i32, i32) {
    %c0_i32 = arith.constant 0 : i32
    %c0_i32_0 = arith.constant 0 : i32
    %c0_i32_1 = arith.constant 0 : i32
    return %c0_i32, %c0_i32_0 : i32, i32
  }
  func.func @transform_12(%arg0: i32) -> (i32, i32) {
    %c0_i32 = arith.constant 0 : i32
    %c0_i32_0 = arith.constant 0 : i32
    %c0_i32_1 = arith.constant 0 : i32
    return %c0_i32, %c0_i32_0 : i32, i32
  }
  func.func @transform_13(%arg0: i32) -> (i32, i32) {
    %c0_i32 = arith.constant 0 : i32
    %c0_i32_0 = arith.constant 0 : i32
    return %arg0, %c0_i32 : i32, i32
  }
}

</mosaic_0001>

<bundles_post_ra>
// kernel: composed_autoencoder_forward.1
= control target key start
LH: loop header
LB: loop body
LE: loop exit
PB: predicated region body
PF: predicated region fallthrough
CT: control target
= control target key end

     0   :  { %18 = vsyncpa [#allocation3], 0  ;;  %s2123_s0 = inlined_call_operand.vmem [shape: f32[8,256], index: 0, kind: input, shape index: {}]   ;;  %s2124_s1 = inlined_call_operand.hbm [shape: bf16[256,256], index: 1, kind: input, shape index: {}]   ;;  %s2125_s2 = inlined_call_operand.hbm [shape: f32[1,256], index: 2, kind: input, shape index: {}]   ;;  %s2126_s3 = inlined_call_operand.hbm [shape: bf16[256,128], index: 3, kind: input, shape index: {}]   ;;  %s2127_s4 = inlined_call_operand.hbm [shape: f32[1,128], index: 4, kind: input, shape index: {}]   ;;  %s2128_s5 = inlined_call_operand.hbm [shape: bf16[128,128], index: 5, kind: input, shape index: {}]   ;;  %s2129_s6 = inlined_call_operand.hbm [shape: f32[1,128], index: 6, kind: input, shape index: {}]   ;;  %s2130_s7 = inlined_call_operand.vmem [shape: bf16[128,128], index: 7, kind: input, shape index: {}]   ;;  %s2131_s8 = inlined_call_operand.vmem [shape: f32[1,128], index: 8, kind: input, shape index: {}]   ;;  %s2132_s9 = inlined_call_operand.hbm [shape: bf16[128,256], index: 9, kind: input, shape index: {}]   ;;  %s2133_s10 = inlined_call_operand.vmem [shape: f32[1,256], index: 10, kind: input, shape index: {}]   ;;  %s2134_s11 = inlined_call_operand.hbm [shape: bf16[256,256], index: 11, kind: input, shape index: {}]   ;;  %s2135_s12 = inlined_call_operand.vmem [shape: f32[1,256], index: 12, kind: input, shape index: {}]   ;;  %s2136_s13 = inlined_call_operand.vmem [shape: f32[8,256], index: 13, kind: output, shape index: {}]  }
   0x1   :  { %19 = vsyncpa [#allocation5], 0 }
   0x2   :  { %20 = vsyncpa [#allocation8], 0 }
   0x3   :  { %21 = vsyncpa [#allocation11], 0  ;;  %s43_s27 = sshll.u32 %s2125_s2, 4  ;;  %s44_s27 = int_to_ptr.hbm [resolvable:$true] %s43_s27 }
   0x4   :  { %22 = vsyncpa [#allocation14], 0  ;;  %s1963_s28 = smov [#allocation4]   ;;  %s67_s15 = sshll.u32 %s2127_s4, 4  ;;  %s68_s15 = int_to_ptr.hbm [resolvable:$true] %s67_s15 }
   0x5   :  { %s45_s29 = sshll.u32 %s1963_s28, 4  ;;  %s1964_s16 = smov [#allocation7]   ;;  %s46_s29 = int_to_ptr.vmem [resolvable:$true] %s45_s29 }
   0x6   :  { %48 = dma.hbm_to_vmem [thread:$0]  %s44_s27, 32, %s46_s29, [#allocation5]  }
   0x7   :  { %s69_s17 = sshll.u32 %s1964_s16, 4  ;;  %s91_s20 = sshll.u32 %s2129_s6, 4  ;;  %s70_s17 = int_to_ptr.vmem [resolvable:$true] %s69_s17  ;;  %s92_s20 = int_to_ptr.hbm [resolvable:$true] %s91_s20 }
   0x8   :  { %72 = dma.hbm_to_vmem [thread:$0]  %s68_s15, 16, %s70_s17, [#allocation8]  }
   0x9   :  { %s29_s22 = sshll.u32 %s2124_s1, 4  ;;  %s1965_s23 = smov [#allocation10]   ;;  %s30_s22 = int_to_ptr.hbm [resolvable:$true] %s29_s22 }
   0xa   :  { %s93_s24 = sshll.u32 %s1965_s23, 4  ;;  %s1966_s4 = smov [#allocation2]   ;;  %s94_s24 = int_to_ptr.vmem [resolvable:$true] %s93_s24 }
   0xb   :  { %96 = dma.hbm_to_vmem [thread:$0]  %s92_s20, 16, %s94_s24, [#allocation11]  }
   0xc   :  { %s31_s25 = sshll.u32 %s1966_s4, 4  ;;  %s1967_s26 = smov 128   ;;  %s32_s25 = int_to_ptr.vmem [resolvable:$true] %s31_s25 }
   0xd   :  { %s1968_s27 = smov 8   ;;  %s53_s29 = sshll.u32 %s2126_s3, 4  ;;  %s54_s29 = int_to_ptr.hbm [resolvable:$true] %s53_s29 }
   0xe   :  { %37 = dma.hbm_to_vmem [thread:$0]  %s30_s22, 4096, %s32_s25, [#allocation3], %s1967_s26, %s1967_s26, %s1968_s27  }
   0xf   :  { %s1969_s1 = smov [#allocation6]   ;;  %s77_s16 = sshll.u32 %s2128_s5, 4  ;;  %s78_s16 = int_to_ptr.hbm [resolvable:$true] %s77_s16 }
  0x10   :  { %s55_s30 = sshll.u32 %s1969_s1, 4  ;;  %s1970_s17 = smov 64   ;;  %s56_s30 = int_to_ptr.vmem [resolvable:$true] %s55_s30 }
  0x11   :  { %s1971_s18 = smov 4   ;;  %s1972_s19 = smov [#allocation9]  }
  0x12   :  { %61 = dma.hbm_to_vmem [thread:$0]  %s54_s29, 2048, %s56_s30, [#allocation5], %s1970_s17, %s1970_s17, %s1971_s18  }
  0x13   :  { %s79_s20 = sshll.u32 %s1972_s19, 4  ;;  %s105_s22 = sshll.u32 %s2132_s9, 4  ;;  %s80_s20 = int_to_ptr.vmem [resolvable:$true] %s79_s20  ;;  %s106_s22 = int_to_ptr.hbm [resolvable:$true] %s105_s22 }
  0x14   :  { %85 = dma.hbm_to_vmem [thread:$0]  %s78_s16, 1024, %s80_s20, [#allocation8], %s1970_s17, %s1970_s17, %s1971_s18  }
  0x15   :  { %s120_s24 = sshll.u32 %s2134_s11, 4  ;;  %s1973_s4 = smov [#allocation12]   ;;  %s121_s24 = int_to_ptr.hbm [resolvable:$true] %s120_s24 }
  0x16   :  { %s107_s25 = sshll.u32 %s1973_s4, 4  ;;  %s1974_s5 = smov [#allocation13]   ;;  %s108_s25 = int_to_ptr.vmem [resolvable:$true] %s107_s25 }
  0x17   :  { %113 = dma.hbm_to_vmem [thread:$0]  %s106_s22, 2048, %s108_s25, [#allocation11], %s1967_s26, %s1967_s26, %s1968_s27  }
  0x18   :  { %s122_s6 = sshll.u32 %s1974_s5, 4  ;;  %s123_s6 = int_to_ptr.vmem [resolvable:$true] %s122_s6 }
  0x19   :  { %128 = dma.hbm_to_vmem [thread:$0]  %s121_s24, 4096, %s123_s6, [#allocation14], %s1967_s26, %s1967_s26, %s1968_s27  }
  0x1a   :  { %1953 = dma.done.wait [#allocation3], 4096  }
  0x1b   :  { %1954 = vsyncadd [#allocation3], 4294963200 }
  0x1c   :  { %1955 = dma.done.wait [#allocation5], 2080  }
  0x1d   :  { %1956 = vsyncadd [#allocation5], 4294965216 }
  0x1e   :  { %1957 = dma.done.wait [#allocation8], 1040  }
  0x1f   :  { %1958 = vsyncadd [#allocation8], 4294966256 }
  0x20   :  { %1959 = dma.done.wait [#allocation11], 2064  }
  0x21   :  { %1960 = vsyncadd [#allocation11], 4294965232 }
  0x22   :  { %1961 = dma.done.wait [#allocation14], 4096  }
  0x23   :  { %1962 = vsyncadd [#allocation14], 4294963200  ;;  %v1236_v0 = vld [vmem:[#allocation2 + $0x70] sm:$0xf]  ;;  %v1641_v1 = vld [vmem:[#allocation2 + $0x74] sm:$0xf0] }
  0x24   :  { %v1300_v2 = vld [vmem:[#allocation2 + $0xf0] sm:$0xf]  ;;  %v1237_v3 = vor.u32 %v1641_v1, %v1236_v0  ;;  %v1657_v4 = vld [vmem:[#allocation2 + $0xf4] sm:$0xf0]  ;;  %v1640_v5 = vld [vmem:[#allocation2 + $0x74] sm:$0xf] }
  0x25   :  { %v1238_v6 = vld [vmem:[#allocation2 + $0x78] sm:$0xf0]  ;;  %v1301_v7 = vor.u32 %v1657_v4, %v1300_v2  ;;  %v1656_v9 = vld [vmem:[#allocation2 + $0xf4] sm:$0xf]  ;;  %v1228_v11 = vld [vmem:[#allocation2 + $0x60] sm:$0xf] }
  0x26   :  { %v1241_v8 = vor.u32 %v1640_v5, %v1238_v6  ;;  %v1302_v10 = vld [vmem:[#allocation2 + $0xf8] sm:$0xf0]  ;;  %365 = vmatpush.bf16.msra.mxu0 %v1237_v3  ;;  %v1639_v13 = vld [vmem:[#allocation2 + $0x64] sm:$0xf0]  ;;  %v1292_v14 = vld [vmem:[#allocation2 + $0xe0] sm:$0xf] }
  0x27   :  { %v1305_v12 = vor.u32 %v1656_v9, %v1302_v10  ;;  %v1655_v15 = vld [vmem:[#allocation2 + $0xe4] sm:$0xf0]  ;;  %378 = vmatpush.bf16.msra.mxu1 %v1301_v7  ;;  %v1229_v16 = vor.u32 %v1639_v13, %v1228_v11  ;;  %v1638_v18 = vld [vmem:[#allocation2 + $0x64] sm:$0xf]  ;;  %v1230_v19 = vld [vmem:[#allocation2 + $0x68] sm:$0xf0] }
  0x28   :  { %391 = vmatpush.bf16.msra.mxu2 %v1241_v8  ;;  %v1293_v17 = vor.u32 %v1655_v15, %v1292_v14  ;;  %v1654_v20 = vld [vmem:[#allocation2 + $0xe4] sm:$0xf]  ;;  %v1233_v21 = vor.u32 %v1638_v18, %v1230_v19  ;;  %v1294_v22 = vld [vmem:[#allocation2 + $0xe8] sm:$0xf0]  ;;  %v1220_v23 = vld [vmem:[#allocation2 + $0x50] sm:$0xf] }
  0x29   :  { %404 = vmatpush.bf16.msra.mxu3 %v1305_v12  ;;  %v1637_v24 = vld [vmem:[#allocation2 + $0x54] sm:$0xf0]  ;;  %v1297_v25 = vor.u32 %v1654_v20, %v1294_v22  ;;  %v1284_v26 = vld [vmem:[#allocation2 + $0xd0] sm:$0xf]  ;;  %v1636_v28 = vld [vmem:[#allocation2 + $0x54] sm:$0xf] }
  0x2a   :  { %v1653_v27 = vld [vmem:[#allocation2 + $0xd4] sm:$0xf0]  ;;  %366 = vmatpush.bf16.msra.mxu0 %v1229_v16  ;;  %v1221_v29 = vor.u32 %v1637_v24, %v1220_v23  ;;  %v1222_v30 = vld [vmem:[#allocation2 + $0x58] sm:$0xf0]  ;;  %v1652_v31 = vld [vmem:[#allocation2 + $0xd4] sm:$0xf] }
  0x2b   :  { %v1286_v32 = vld [vmem:[#allocation2 + $0xd8] sm:$0xf0]  ;;  %379 = vmatpush.bf16.msra.mxu1 %v1293_v17  ;;  %v1285_v33 = vor.u32 %v1653_v27, %v1284_v26  ;;  %v1225_v34 = vor.u32 %v1636_v28, %v1222_v30  ;;  %v1212_v35 = vld [vmem:[#allocation2 + $0x40] sm:$0xf]  ;;  %v1635_v36 = vld [vmem:[#allocation2 + $0x44] sm:$0xf0] }
  0x2c   :  { %392 = vmatpush.bf16.msra.mxu2 %v1233_v21  ;;  %v1276_v37 = vld [vmem:[#allocation2 + $0xc0] sm:$0xf]  ;;  %v1289_v38 = vor.u32 %v1652_v31, %v1286_v32  ;;  %v1651_v39 = vld [vmem:[#allocation2 + $0xc4] sm:$0xf0]  ;;  %v1634_v40 = vld [vmem:[#allocation2 + $0x44] sm:$0xf]  ;;  %v1213_v44 = vor.u32 %v1635_v36, %v1212_v35 }
  0x2d   :  { %405 = vmatpush.bf16.msra.mxu3 %v1297_v25  ;;  %v1214_v41 = vld [vmem:[#allocation2 + $0x48] sm:$0xf0]  ;;  %v1650_v42 = vld [vmem:[#allocation2 + $0xc4] sm:$0xf]  ;;  %v1277_v45 = vor.u32 %v1651_v39, %v1276_v37  ;;  %v1204_v47 = vld [vmem:[#allocation2 + $0x30] sm:$0xf] }
  0x2e   :  { %v1278_v43 = vld [vmem:[#allocation2 + $0xc8] sm:$0xf0]  ;;  %367 = vmatpush.bf16.msra.mxu0 %v1221_v29  ;;  %v1217_v46 = vor.u32 %v1634_v40, %v1214_v41  ;;  %v1633_v48 = vld [vmem:[#allocation2 + $0x34] sm:$0xf0]  ;;  %v1268_v49 = vld [vmem:[#allocation2 + $0xb0] sm:$0xf] }
  0x2f   :  { %380 = vmatpush.bf16.msra.mxu1 %v1285_v33  ;;  %v1281_v50 = vor.u32 %v1650_v42, %v1278_v43  ;;  %v1649_v51 = vld [vmem:[#allocation2 + $0xb4] sm:$0xf0]  ;;  %v1632_v52 = vld [vmem:[#allocation2 + $0x34] sm:$0xf]  ;;  %v1206_v53 = vld [vmem:[#allocation2 + $0x38] sm:$0xf0]  ;;  %v1205_v56 = vor.u32 %v1633_v48, %v1204_v47 }
  0x30   :  { %393 = vmatpush.bf16.msra.mxu2 %v1225_v34  ;;  %v1648_v54 = vld [vmem:[#allocation2 + $0xb4] sm:$0xf]  ;;  %v1270_v55 = vld [vmem:[#allocation2 + $0xb8] sm:$0xf0]  ;;  %v1269_v57 = vor.u32 %v1649_v51, %v1268_v49  ;;  %v1209_v58 = vor.u32 %v1632_v52, %v1206_v53  ;;  %v1196_v59 = vld [vmem:[#allocation2 + $0x20] sm:$0xf] }
  0x31   :  { %406 = vmatpush.bf16.msra.mxu3 %v1289_v38  ;;  %v1631_v60 = vld [vmem:[#allocation2 + $0x24] sm:$0xf0]  ;;  %v1260_v61 = vld [vmem:[#allocation2 + $0xa0] sm:$0xf]  ;;  %v1273_v62 = vor.u32 %v1648_v54, %v1270_v55  ;;  %v1630_v0 = vld [vmem:[#allocation2 + $0x24] sm:$0xf] }
  0x32   :  { %368 = vmatpush.bf16.msra.mxu0 %v1213_v44  ;;  %v1647_v63 = vld [vmem:[#allocation2 + $0xa4] sm:$0xf0]  ;;  %v1198_v1 = vld [vmem:[#allocation2 + $0x28] sm:$0xf0]  ;;  %v1646_v2 = vld [vmem:[#allocation2 + $0xa4] sm:$0xf]  ;;  %v1197_v4 = vor.u32 %v1631_v60, %v1196_v59 }
  0x33   :  { %381 = vmatpush.bf16.msra.mxu1 %v1277_v45  ;;  %v1262_v3 = vld [vmem:[#allocation2 + $0xa8] sm:$0xf0]  ;;  %v1261_v5 = vor.u32 %v1647_v63, %v1260_v61  ;;  %v1201_v6 = vor.u32 %v1630_v0, %v1198_v1  ;;  %v1188_v7 = vld [vmem:[#allocation2 + $0x10] sm:$0xf]  ;;  %v1629_v8 = vld [vmem:[#allocation2 + $0x14] sm:$0xf0] }
  0x34   :  { %394 = vmatpush.bf16.msra.mxu2 %v1217_v46  ;;  %v1252_v9 = vld [vmem:[#allocation2 + $0x90] sm:$0xf]  ;;  %v1265_v10 = vor.u32 %v1646_v2, %v1262_v3  ;;  %v1645_v11 = vld [vmem:[#allocation2 + $0x94] sm:$0xf0]  ;;  %v1628_v12 = vld [vmem:[#allocation2 + $0x14] sm:$0xf]  ;;  %v1189_v16 = vor.u32 %v1629_v8, %v1188_v7 }
  0x35   :  { %407 = vmatpush.bf16.msra.mxu3 %v1281_v50  ;;  %v1190_v13 = vld [vmem:[#allocation2 + $0x18] sm:$0xf0]  ;;  %v1644_v14 = vld [vmem:[#allocation2 + $0x94] sm:$0xf]  ;;  %v1180_v17 = vld [vmem:[#allocation2] sm:$0xf]  ;;  %v1253_v19 = vor.u32 %v1645_v11, %v1252_v9 }
  0x36   :  { %369 = vmatpush.bf16.msra.mxu0 %v1205_v56  ;;  %v1254_v15 = vld [vmem:[#allocation2 + $0x98] sm:$0xf0]  ;;  %v1627_v18 = vld [vmem:[#allocation2 + $0x4] sm:$0xf0]  ;;  %v1193_v20 = vor.u32 %v1628_v12, %v1190_v13  ;;  %v1244_v21 = vld [vmem:[#allocation2 + $0x80] sm:$0xf] }
  0x37   :  { %382 = vmatpush.bf16.msra.mxu1 %v1269_v57  ;;  %v1643_v22 = vld [vmem:[#allocation2 + $0x84] sm:$0xf0]  ;;  %v1626_v23 = vld [vmem:[#allocation2 + $0x4] sm:$0xf]  ;;  %v1257_v24 = vor.u32 %v1644_v14, %v1254_v15  ;;  %v1182_v25 = vld [vmem:[#allocation2 + $0x8] sm:$0xf0]  ;;  %v1181_v28 = vor.u32 %v1627_v18, %v1180_v17 }
  0x38   :  { %395 = vmatpush.bf16.msra.mxu2 %v1209_v58  ;;  %v1642_v26 = vld [vmem:[#allocation2 + $0x84] sm:$0xf]  ;;  %v1246_v27 = vld [vmem:[#allocation2 + $0x88] sm:$0xf0]  ;;  %v1245_v30 = vor.u32 %v1643_v22, %v1244_v21  ;;  %v1185_v31 = vor.u32 %v1626_v23, %v1182_v25  ;;  %v1665_v34 = vld [vmem:[#allocation6 + $0x38] sm:$0xff] }
  0x39   :  { %408 = vmatpush.bf16.msra.mxu3 %v1273_v62  ;;  %v163_v29 = vld [vmem:[%s2123_s0] sm:$0xff]  ;;  %v164_v32 = vld [vmem:[%s2123_s0 + $0x8] sm:$0xff]  ;;  %v1249_v33 = vor.u32 %v1642_v26, %v1246_v27  ;;  %v1664_v38 = vld [vmem:[#allocation6 + $0x30] sm:$0xff] }
  0x3a   :  { %370 = vmatpush.bf16.msra.mxu0 %v1197_v4  ;;  %v165_v35 = vpack.c.bf16 %v163_v29, %v163_v29  ;;  %v1673_v36 = vld [vmem:[#allocation6 + $0x78] sm:$0xff]  ;;  %v166_v37 = vpack.c.bf16 %v164_v32, %v164_v32  ;;  %v1672_v39 = vld [vmem:[#allocation6 + $0x70] sm:$0xff]  ;;  %v1663_v40 = vld [vmem:[#allocation6 + $0x28] sm:$0xff] }
  0x3b   :  { %383 = vmatpush.bf16.msra.mxu1 %v1261_v5  ;;  %v1671_v41 = vld [vmem:[#allocation6 + $0x68] sm:$0xff]  ;;  %v1662_v42 = vld [vmem:[#allocation6 + $0x20] sm:$0xff]  ;;  %v1661_v44 = vld [vmem:[#allocation6 + $0x18] sm:$0xff] }
  0x3c   :  { %396 = vmatpush.bf16.msra.mxu2 %v1201_v6  ;;  %v1670_v43 = vld [vmem:[#allocation6 + $0x60] sm:$0xff]  ;;  %v1660_v45 = vld [vmem:[#allocation6 + $0x10] sm:$0xff]  ;;  %v1669_v46 = vld [vmem:[#allocation6 + $0x58] sm:$0xff] }
  0x3d   :  { %409 = vmatpush.bf16.msra.mxu3 %v1265_v10  ;;  %v1659_v47 = vld [vmem:[#allocation6 + $0x8] sm:$0xff]  ;;  %v1668_v48 = vld [vmem:[#allocation6 + $0x50] sm:$0xff]  ;;  %v1658_v49 = vld [vmem:[#allocation6] sm:$0xff] }
  0x3e   :  { %371 = vmatpush.bf16.msra.mxu0 %v1189_v16  ;;  %v1667_v50 = vld [vmem:[#allocation6 + $0x48] sm:$0xff]  ;;  %v1666_v51 = vld [vmem:[#allocation6 + $0x40] sm:$0xff]  ;;  %v1680_v53 = vld [vmem:[#allocation9 + $0x30] sm:$0xff] }
  0x3f   :  { %384 = vmatpush.bf16.msra.mxu1 %v1253_v19  ;;  %v1681_v52 = vld [vmem:[#allocation9 + $0x38] sm:$0xff]  ;;  %v1679_v54 = vld [vmem:[#allocation9 + $0x28] sm:$0xff]  ;;  %v1678_v56 = vld [vmem:[#allocation9 + $0x20] sm:$0xff] }
  0x40   :  { %397 = vmatpush.bf16.msra.mxu2 %v1193_v20  ;;  %v199_v55 = vld [vmem:[#allocation4] sm:$0x3]  ;;  %v1676_v12 = vld [vmem:[#allocation9 + $0x10] sm:$0xff]  ;;  %v1675_v13 = vld [vmem:[#allocation9 + $0x8] sm:$0xff] }
  0x41   :  { %410 = vmatpush.bf16.msra.mxu3 %v1257_v24  ;;  %v201_v57 = vperm.slane %v199_v55, 0  ;;  %v1677_v58 = vld [vmem:[#allocation9 + $0x18] sm:$0xff]  ;;  %v202_v63 = vperm.slane %v199_v55, 1  ;;  %v1674_v14 = vld [vmem:[#allocation9] sm:$0xff]  ;;  %v1688_v16 = vld [vmem:[%s2130_s7 + $0x30] sm:$0xff] }
  0x42   :  { %372 = vmatpush.bf16.msra.mxu0 %v1181_v28  ;;  %v1689_v15 = vld [vmem:[%s2130_s7 + $0x38] sm:$0xff]  ;;  %v1687_v17 = vld [vmem:[%s2130_s7 + $0x28] sm:$0xff]  ;;  %v1686_v18 = vld [vmem:[%s2130_s7 + $0x20] sm:$0xff] }
  0x43   :  { %385 = vmatpush.bf16.msra.mxu1 %v1245_v30  ;;  %v1685_v19 = vld [vmem:[%s2130_s7 + $0x18] sm:$0xff]  ;;  %v1750_v20 = vld [vmem:[#allocation7] ss:$0 sm:$0xff]  ;;  %v1684_v22 = vld [vmem:[%s2130_s7 + $0x10] sm:$0xff] }
  0x44   :  { %398 = vmatpush.bf16.msra.mxu2 %v1185_v31  ;;  %v1683_v30 = vld [vmem:[%s2130_s7 + $0x8] sm:$0xff]  ;;  %v1682_v31 = vld [vmem:[%s2130_s7] sm:$0xff]  ;;  %v1492_v32 = vld [vmem:[#allocation12 + $0x70] sm:$0xf] }
  0x45   :  { %411 = vmatpush.bf16.msra.mxu3 %v1249_v33  ;;  %373 = vmatmul.bf16.vlgmr.msra.gmra.mxu0 %v165_v35  ;;  %v1705_v33 = vld [vmem:[#allocation12 + $0x74] sm:$0xf0] }
  0x46   :  { %553 = vmatpush.bf16.msrb.mxu0 %v1665_v34  ;;  %386 = vmatmul.bf16.vlgmr.msra.gmra.mxu1 %v166_v37  ;;  %v1704_v34 = vld [vmem:[#allocation12 + $0x74] sm:$0xf] }
  0x47   :  { %566 = vmatpush.bf16.msrb.mxu1 %v1673_v36  ;;  %399 = vmatmul.bf16.vlgmr.msra.gmra.mxu2 %v165_v35  ;;  %v1493_v35 = vor.u32 %v1705_v33, %v1492_v32  ;;  %v1494_v36 = vld [vmem:[#allocation12 + $0x78] sm:$0xf0]  ;;  %v1548_v33 = vld [vmem:[#allocation13 + $0x60] sm:$0xf] }
  0x48   :  { %412 = vmatmul.bf16.vlgmr.msra.gmra.mxu3 %v166_v37  ;;  %649 = vmatpush.bf16.msrb.mxu2 %v1681_v52  ;;  %v1484_v37 = vld [vmem:[#allocation12 + $0x60] sm:$0xf]  ;;  %v1698_v52 = vld [vmem:[#allocation12 + $0x44] sm:$0xf]  ;;  %v1622_v32 = vld [vmem:[#allocation13 + $0xf8] sm:$0xf0] }
  0x49   :  { %732 = vmatpush.bf16.msrb.mxu3 %v1689_v15 }
  0x4a   :  { %554 = vmatpush.bf16.msrb.mxu0 %v1664_v38  ;;  %v1703_v38 = vld [vmem:[#allocation12 + $0x64] sm:$0xf0] }
  0x4b   :  { %567 = vmatpush.bf16.msrb.mxu1 %v1672_v39  ;;  %v1497_v39 = vor.u32 %v1704_v34, %v1494_v36  ;;  %v1612_v36 = vld [vmem:[#allocation13 + $0xe0] sm:$0xf] }
  0x4c   :  { %650 = vmatpush.bf16.msrb.mxu2 %v1680_v53  ;;  %v1470_v53 = vld [vmem:[#allocation12 + $0x48] sm:$0xf0] }
  0x4d   :  { %733 = vmatpush.bf16.msrb.mxu3 %v1688_v16  ;;  %v1473_v55 = vor.u32 %v1698_v52, %v1470_v53  ;;  %v1436_v16 = vld [vmem:[#allocation12] sm:$0xf]  ;;  %v1542_v52 = vld [vmem:[#allocation13 + $0x58] sm:$0xf0]  ;;  %v1732_v53 = vld [vmem:[#allocation13 + $0xd4] sm:$0xf] }
  0x4e   :  { %555 = vmatpush.bf16.msrb.mxu0 %v1663_v40  ;;  %v1702_v40 = vld [vmem:[#allocation12 + $0x64] sm:$0xf] }
  0x4f   :  { %568 = vmatpush.bf16.msrb.mxu1 %v1671_v41  ;;  %v1486_v41 = vld [vmem:[#allocation12 + $0x68] sm:$0xf0] }
  0x50   :  { %651 = vmatpush.bf16.msrb.mxu2 %v1679_v54 }
  0x51   :  { %734 = vmatpush.bf16.msrb.mxu3 %v1687_v17  ;;  %v1691_v17 = vld [vmem:[#allocation12 + $0x4] sm:$0xf0] }
  0x52   :  { %556 = vmatpush.bf16.msrb.mxu0 %v1662_v42  ;;  %v1485_v42 = vor.u32 %v1703_v38, %v1484_v37  ;;  %v1735_v37 = vld [vmem:[#allocation13 + $0xe4] sm:$0xf0] }
  0x53   :  { %569 = vmatpush.bf16.msrb.mxu1 %v1670_v43  ;;  %v1489_v43 = vor.u32 %v1702_v40, %v1486_v41  ;;  %v1718_v40 = vld [vmem:[#allocation13 + $0x64] sm:$0xf]  ;;  %v1550_v41 = vld [vmem:[#allocation13 + $0x68] sm:$0xf0] }
  0x54   :  { %652 = vmatpush.bf16.msrb.mxu2 %v1678_v56  ;;  %v1460_v56 = vld [vmem:[#allocation12 + $0x30] sm:$0xf] }
  0x55   :  { %735 = vmatpush.bf16.msrb.mxu3 %v1686_v18  ;;  %v1690_v18 = vld [vmem:[#allocation12 + $0x4] sm:$0xf] }
  0x56   :  { %557 = vmatpush.bf16.msrb.mxu0 %v1661_v44  ;;  %v1476_v44 = vld [vmem:[#allocation12 + $0x50] sm:$0xf] }
  0x57   :  { %570 = vmatpush.bf16.msrb.mxu1 %v1669_v46  ;;  %v1700_v46 = vld [vmem:[#allocation12 + $0x54] sm:$0xf] }
  0x58   :  { %653 = vmatpush.bf16.msrb.mxu2 %v1677_v58  ;;  %v1696_v58 = vld [vmem:[#allocation12 + $0x34] sm:$0xf] }
  0x59   :  { %736 = vmatpush.bf16.msrb.mxu3 %v1685_v19  ;;  %v1437_v19 = vor.u32 %v1691_v17, %v1436_v16  ;;  %v1516_v17 = vld [vmem:[#allocation13 + $0x20] sm:$0xf] }
  0x5a   :  { %558 = vmatpush.bf16.msrb.mxu0 %v1660_v45  ;;  %v1701_v45 = vld [vmem:[#allocation12 + $0x54] sm:$0xf0] }
  0x5b   :  { %571 = vmatpush.bf16.msrb.mxu1 %v1668_v48  ;;  %v1477_v48 = vor.u32 %v1701_v45, %v1476_v44  ;;  %v1614_v44 = vld [vmem:[#allocation13 + $0xe8] sm:$0xf0]  ;;  %v1540_v45 = vld [vmem:[#allocation13 + $0x50] sm:$0xf] }
  0x5c   :  { %654 = vmatpush.bf16.msrb.mxu2 %v1676_v12  ;;  %v1692_v12 = vld [vmem:[#allocation12 + $0x14] sm:$0xf] }
  0x5d   :  { %737 = vmatpush.bf16.msrb.mxu3 %v1684_v22  ;;  %v1556_v22 = vld [vmem:[#allocation13 + $0x70] sm:$0xf] }
  0x5e   :  { %559 = vmatpush.bf16.msrb.mxu0 %v1659_v47  ;;  %v1478_v47 = vld [vmem:[#allocation12 + $0x58] sm:$0xf0] }
  0x5f   :  { %572 = vmatpush.bf16.msrb.mxu1 %v1667_v50  ;;  %v1468_v50 = vld [vmem:[#allocation12 + $0x40] sm:$0xf] }
  0x60   :  { %655 = vmatpush.bf16.msrb.mxu2 %v1675_v13 }
  0x61   :  { %738 = vmatpush.bf16.msrb.mxu3 %v1683_v30 }
  0x62   :  { %560 = vmatpush.bf16.msrb.mxu0 %v1658_v49  ;;  %v1481_v49 = vor.u32 %v1700_v46, %v1478_v47  ;;  %v1717_v46 = vld [vmem:[#allocation13 + $0x54] sm:$0xf0] }
  0x63   :  { %573 = vmatpush.bf16.msrb.mxu1 %v1666_v51  ;;  %v1699_v51 = vld [vmem:[#allocation12 + $0x44] sm:$0xf0] }
  0x64   :  { %656 = vmatpush.bf16.msrb.mxu2 %v1674_v14  ;;  %v1469_v54 = vor.u32 %v1699_v51, %v1468_v50  ;;  %v1446_v14 = vld [vmem:[#allocation12 + $0x18] sm:$0xf0]  ;;  %v1716_v50 = vld [vmem:[#allocation13 + $0x54] sm:$0xf]  ;;  %v1541_v51 = vor.u32 %v1717_v46, %v1540_v45 }
  0x65   :  { %739 = vmatpush.bf16.msrb.mxu3 %v1682_v31  ;;  %v1449_v15 = vor.u32 %v1692_v12, %v1446_v14  ;;  %v1736_v31 = vld [vmem:[#allocation13 + $0xf4] sm:$0xf]  ;;  %v1574_v46 = vld [vmem:[#allocation13 + $0x98] sm:$0xf0] }
  0x66   :  { %849 = vmatpush.bf16.msra.mxu0 %v1493_v35  ;;  %v1625_v34 = vor.u32 %v1736_v31, %v1622_v32  ;;  %v1719_v35 = vld [vmem:[#allocation13 + $0x64] sm:$0xf0]  ;;  %v1728_v12 = vld [vmem:[#allocation13 + $0xb4] sm:$0xf] }
  0x67   :  { %862 = vmatpush.bf16.msra.mxu1 %v1497_v39  ;;  %v1549_v38 = vor.u32 %v1719_v35, %v1548_v33  ;;  %v1613_v39 = vor.u32 %v1735_v37, %v1612_v36  ;;  %v1508_v36 = vld [vmem:[#allocation13 + $0x10] sm:$0xf]  ;;  %v1709_v37 = vld [vmem:[#allocation13 + $0x14] sm:$0xf0]  ;;  %v1724_v45 = vld [vmem:[#allocation13 + $0x94] sm:$0xf] }
  0x6a   :  { %850 = vmatpush.bf16.msra.mxu0 %v1485_v42  ;;  %v1734_v42 = vld [vmem:[#allocation13 + $0xe4] sm:$0xf] }
  0x6b   :  { %863 = vmatpush.bf16.msra.mxu1 %v1489_v43  ;;  %v1553_v43 = vor.u32 %v1718_v40, %v1550_v41  ;;  %v1617_v47 = vor.u32 %v1734_v42, %v1614_v44  ;;  %v1725_v40 = vld [vmem:[#allocation13 + $0x94] sm:$0xf0]  ;;  %v1708_v41 = vld [vmem:[#allocation13 + $0x14] sm:$0xf]  ;;  %v1510_v42 = vld [vmem:[#allocation13 + $0x18] sm:$0xf0] }
  0x6c   :  { %v1513_v44 = vor.u32 %v1708_v41, %v1510_v42 }
  0x6e   :  { %851 = vmatpush.bf16.msra.mxu0 %v1477_v48  ;;  %v1604_v48 = vld [vmem:[#allocation13 + $0xd0] sm:$0xf] }
  0x6f   :  { %864 = vmatpush.bf16.msra.mxu1 %v1481_v49  ;;  %v1733_v49 = vld [vmem:[#allocation13 + $0xd4] sm:$0xf0] }
  0x72   :  { %852 = vmatpush.bf16.msra.mxu0 %v1469_v54  ;;  %v1606_v54 = vld [vmem:[#allocation13 + $0xd8] sm:$0xf0] }
  0x73   :  { %865 = vmatpush.bf16.msra.mxu1 %v1473_v55  ;;  %v1605_v55 = vor.u32 %v1733_v49, %v1604_v48  ;;  %v1500_v48 = vld [vmem:[#allocation13] sm:$0xf]  ;;  %v1707_v49 = vld [vmem:[#allocation13 + $0x4] sm:$0xf0] }
  0xc2   :  { %v374_v59 = vpop.f32.mrf.mxu0 }
  0xc3   :  { %v375_v60 = vadd.f32 %v374_v59, %v201_v57  ;;  %v387_v61 = vpop.f32.mrf.mxu1  ;;  %v1697_v57 = vld [vmem:[#allocation12 + $0x34] sm:$0xf0]  ;;  %v1462_v59 = vld [vmem:[#allocation12 + $0x38] sm:$0xf0] }
  0xc5   :  { %v388_v62 = vadd.f32 %v387_v61, %v375_v60  ;;  %v1461_v60 = vor.u32 %v1697_v57, %v1460_v56  ;;  %v1465_v61 = vor.u32 %v1696_v58, %v1462_v59  ;;  %v1545_v56 = vor.u32 %v1716_v50, %v1542_v52  ;;  %v1532_v57 = vld [vmem:[#allocation13 + $0x40] sm:$0xf]  ;;  %v1715_v58 = vld [vmem:[#allocation13 + $0x44] sm:$0xf0] }
  0xc6   :  { %v1596_v59 = vld [vmem:[#allocation13 + $0xc0] sm:$0xf]  ;;  %v1723_v52 = vld [vmem:[#allocation13 + $0x84] sm:$0xf0] }
  0xc7   :  { %v417_v0 = vmax.f32 %v388_v62, 0.0  ;;  %v1452_v62 = vld [vmem:[#allocation12 + $0x20] sm:$0xf]  ;;  %853 = vmatpush.bf16.msra.mxu0 %v1461_v60  ;;  %866 = vmatpush.bf16.msra.mxu1 %v1465_v61  ;;  %v1609_v60 = vor.u32 %v1732_v53, %v1606_v54  ;;  %v1731_v61 = vld [vmem:[#allocation13 + $0xc4] sm:$0xf0] }
  0xc8   :  { %v1564_v50 = vld [vmem:[#allocation13 + $0x80] sm:$0xf]  ;;  %v1706_v53 = vld [vmem:[#allocation13 + $0x4] sm:$0xf]  ;;  %v1502_v54 = vld [vmem:[#allocation13 + $0x8] sm:$0xf0] }
  0xc9   :  { %v419_v1 = vpack.c.bf16 %v417_v0, %v417_v0  ;;  %v1694_v0 = vld [vmem:[#allocation12 + $0x24] sm:$0xf] }
  0xca   :  { %v400_v2 = vpop.f32.mrf.mxu2  ;;  %v376_v5 = vpop.f32.mrf.mxu0 }
  0xcb   :  { %v401_v3 = vadd.f32 %v400_v2, %v202_v63  ;;  %v413_v4 = vpop.f32.mrf.mxu3  ;;  %v389_v6 = vpop.f32.mrf.mxu1  ;;  %561 = vmatmul.bf16.vlgmr.msrb.gmra.mxu0 %v419_v1  ;;  %v1695_v63 = vld [vmem:[#allocation12 + $0x24] sm:$0xf0]  ;;  %v1454_v1 = vld [vmem:[#allocation12 + $0x28] sm:$0xf0] }
  0xcc   :  { %v1453_v2 = vor.u32 %v1695_v63, %v1452_v62  ;;  %v1714_v62 = vld [vmem:[#allocation13 + $0x44] sm:$0xf]  ;;  %v1534_v63 = vld [vmem:[#allocation13 + $0x48] sm:$0xf0] }
  0xcd   :  { %v414_v7 = vadd.f32 %v413_v4, %v401_v3  ;;  %v1457_v3 = vor.u32 %v1694_v0, %v1454_v1  ;;  %v1751_v4 = vld [vmem:[#allocation10] ss:$0 sm:$0xff]  ;;  %v1730_v0 = vld [vmem:[#allocation13 + $0xc4] sm:$0xf]  ;;  %v1598_v1 = vld [vmem:[#allocation13 + $0xc8] sm:$0xf0] }
  0xce   :  { %854 = vmatpush.bf16.msra.mxu0 %v1453_v2  ;;  %v1533_v2 = vor.u32 %v1715_v58, %v1532_v57  ;;  %v1722_v57 = vld [vmem:[#allocation13 + $0x84] sm:$0xf]  ;;  %v1566_v58 = vld [vmem:[#allocation13 + $0x88] sm:$0xf0] }
  0xcf   :  { %v418_v8 = vmax.f32 %v414_v7, 0.0  ;;  %867 = vmatpush.bf16.msra.mxu1 %v1457_v3  ;;  %v1597_v3 = vor.u32 %v1731_v61, %v1596_v59  ;;  %v1569_v59 = vor.u32 %v1722_v57, %v1566_v58 }
  0xd1   :  { %v420_v9 = vpack.c.bf16 %v418_v8, %v418_v8 }
  0xd2   :  { %v402_v10 = vpop.f32.mrf.mxu2 }
  0xd3   :  { %v415_v11 = vpop.f32.mrf.mxu3  ;;  %574 = vmatmul.bf16.vlgmr.msrb.gmra.mxu1 %v420_v9  ;;  %v1444_v10 = vld [vmem:[#allocation12 + $0x10] sm:$0xf] }
  0xd4   :  { %v1693_v11 = vld [vmem:[#allocation12 + $0x14] sm:$0xf0]  ;;  %868 = vmatpush.bf16.msra.mxu1 %v1449_v15 }
  0xd5   :  { %v1445_v13 = vor.u32 %v1693_v11, %v1444_v10  ;;  %v1712_v10 = vld [vmem:[#allocation13 + $0x34] sm:$0xf]  ;;  %v1526_v11 = vld [vmem:[#allocation13 + $0x38] sm:$0xf0] }
  0xd6   :  { %v1529_v16 = vor.u32 %v1712_v10, %v1526_v11 }
  0xd7   :  { %855 = vmatpush.bf16.msra.mxu0 %v1445_v13  ;;  %v1590_v13 = vld [vmem:[#allocation13 + $0xb8] sm:$0xf0] }
  0xdb   :  { %856 = vmatpush.bf16.msra.mxu0 %v1437_v19  ;;  %v1580_v19 = vld [vmem:[#allocation13 + $0xa0] sm:$0xf] }
 0x148   :  { %v562_v21 = vpop.f32.mrf.mxu0 }
 0x149   :  { %v563_v23 = vadd.f32 %v1750_v20, %v562_v21  ;;  %v1438_v20 = vld [vmem:[#allocation12 + $0x8] sm:$0xf0] }
 0x14a   :  { %v1441_v21 = vor.u32 %v1690_v18, %v1438_v20  ;;  %v1711_v18 = vld [vmem:[#allocation13 + $0x24] sm:$0xf0]  ;;  %v1593_v20 = vor.u32 %v1728_v12, %v1590_v13 }
 0x14c   :  { %869 = vmatpush.bf16.msra.mxu1 %v1441_v21  ;;  %v1727_v21 = vld [vmem:[#allocation13 + $0xa4] sm:$0xf0] }
 0x150   :  { %v575_v24 = vpop.f32.mrf.mxu1  ;;  %v564_v26 = vpop.f32.mrf.mxu0  ;;  %1116 = vmatpush.bf16.msrb.mxu1 %v1625_v34 }
 0x151   :  { %v576_v25 = vadd.f32 %v575_v24, %v563_v23  ;;  %v1721_v23 = vld [vmem:[#allocation13 + $0x74] sm:$0xf0]  ;;  %v1620_v24 = vld [vmem:[#allocation13 + $0xf0] sm:$0xf] }
 0x152   :  { %v1737_v26 = vld [vmem:[#allocation13 + $0xf4] sm:$0xf0] }
 0x153   :  { %v579_v27 = vmax.f32 %v576_v25, 0.0  ;;  %v1557_v25 = vor.u32 %v1721_v23, %v1556_v22  ;;  %v1710_v22 = vld [vmem:[#allocation13 + $0x24] sm:$0xf]  ;;  %v1518_v23 = vld [vmem:[#allocation13 + $0x28] sm:$0xf0] }
 0x154   :  { %1117 = vmatpush.bf16.msrb.mxu1 %v1617_v47  ;;  %v1577_v47 = vor.u32 %v1724_v45, %v1574_v46 }
 0x155   :  { %v580_v28 = vpack.c.bf16 %v579_v27, %v579_v27  ;;  %v1720_v27 = vld [vmem:[#allocation13 + $0x74] sm:$0xf]  ;;  %1077 = vmatpush.bf16.msra.mxu2 %v1557_v25  ;;  %v1582_v25 = vld [vmem:[#allocation13 + $0xa8] sm:$0xf0] }
 0x157   :  { %657 = vmatmul.bf16.vlgmr.msrb.gmra.mxu2 %v580_v28  ;;  %v1558_v28 = vld [vmem:[#allocation13 + $0x78] sm:$0xf0] }
 0x158   :  { %v577_v29 = vpop.f32.mrf.mxu1  ;;  %v1561_v30 = vor.u32 %v1720_v27, %v1558_v28  ;;  %1118 = vmatpush.bf16.msrb.mxu1 %v1609_v60  ;;  %v1581_v27 = vor.u32 %v1727_v21, %v1580_v19  ;;  %v1521_v28 = vor.u32 %v1710_v22, %v1518_v23  ;;  %v763_v60 = vld [vmem:[%s2133_s10] sm:$0x3] }
 0x159   :  { %v1621_v29 = vor.u32 %v1737_v26, %v1620_v24  ;;  %1078 = vmatpush.bf16.msra.mxu2 %v1549_v38  ;;  %v1726_v24 = vld [vmem:[#allocation13 + $0xa4] sm:$0xf]  ;;  %v1517_v26 = vor.u32 %v1711_v18, %v1516_v17  ;;  %v1572_v38 = vld [vmem:[#allocation13 + $0x90] sm:$0xf]  ;;  %v765_v61 = vperm.slane %v763_v60, 0 }
 0x15a   :  { %1103 = vmatpush.bf16.msrb.mxu0 %v1561_v30  ;;  %v1585_v30 = vor.u32 %v1726_v24, %v1582_v25 }
 0x15b   :  { %1090 = vmatpush.bf16.msra.mxu3 %v1621_v29  ;;  %v1752_v29 = vld [vmem:[%s2131_s8] ss:$0 sm:$0xff] }
 0x15d   :  { %1079 = vmatpush.bf16.msra.mxu2 %v1541_v51  ;;  %v1501_v51 = vor.u32 %v1707_v49, %v1500_v48 }
 0x15e   :  { %1104 = vmatpush.bf16.msrb.mxu0 %v1553_v43  ;;  %v1573_v43 = vor.u32 %v1725_v40, %v1572_v38 }
 0x15f   :  { %1091 = vmatpush.bf16.msra.mxu3 %v1613_v39  ;;  %v1509_v39 = vor.u32 %v1709_v37, %v1508_v36 }
 0x161   :  { %1080 = vmatpush.bf16.msra.mxu2 %v1533_v2 }
 0x162   :  { %1105 = vmatpush.bf16.msrb.mxu0 %v1545_v56  ;;  %v1505_v56 = vor.u32 %v1706_v53, %v1502_v54 }
 0x163   :  { %1092 = vmatpush.bf16.msra.mxu3 %v1605_v55  ;;  %v1565_v55 = vor.u32 %v1723_v52, %v1564_v50 }
 0x167   :  { %1093 = vmatpush.bf16.msra.mxu3 %v1597_v3 }
 0x1da   :  { %v658_v5 = vpop.f32.mrf.mxu2 }
 0x1db   :  { %v659_v6 = vadd.f32 %v1751_v4, %v658_v5  ;;  %v1537_v4 = vor.u32 %v1714_v62, %v1534_v63  ;;  %v1524_v5 = vld [vmem:[#allocation13 + $0x30] sm:$0xf]  ;;  %v766_v62 = vperm.slane %v763_v60, 1 }
 0x1dd   :  { %v662_v7 = vmax.f32 %v659_v6, 0.0  ;;  %v1713_v6 = vld [vmem:[#allocation13 + $0x34] sm:$0xf0]  ;;  %1106 = vmatpush.bf16.msrb.mxu0 %v1537_v4 }
 0x1de   :  { %v1525_v14 = vor.u32 %v1713_v6, %v1524_v5 }
 0x1df   :  { %v663_v8 = vpack.c.bf16 %v662_v7, %v662_v7  ;;  %v1588_v7 = vld [vmem:[#allocation13 + $0xb0] sm:$0xf] }
 0x1e0   :  { %1081 = vmatpush.bf16.msra.mxu2 %v1525_v14 }
 0x1e1   :  { %740 = vmatmul.bf16.vlgmr.msrb.gmra.mxu3 %v663_v8  ;;  %v1601_v8 = vor.u32 %v1730_v0, %v1598_v1  ;;  %1107 = vmatpush.bf16.msrb.mxu0 %v1529_v16 }
 0x1e2   :  { %v660_v9 = vpop.f32.mrf.mxu2 }
 0x1e3   :  { %v1729_v9 = vld [vmem:[#allocation13 + $0xb4] sm:$0xf0]  ;;  %1119 = vmatpush.bf16.msrb.mxu1 %v1601_v8 }
 0x1e4   :  { %v1589_v15 = vor.u32 %v1729_v9, %v1588_v7  ;;  %1082 = vmatpush.bf16.msra.mxu2 %v1517_v26  ;;  %v911_v9 = vld [vmem:[%s2135_s12] sm:$0x3] }
 0x1e5   :  { %1108 = vmatpush.bf16.msrb.mxu0 %v1521_v28  ;;  %v914_v10 = vperm.slane %v911_v9, 1  ;;  %v913_v14 = vperm.slane %v911_v9, 0 }
 0x1e6   :  { %1094 = vmatpush.bf16.msra.mxu3 %v1589_v15 }
 0x1e7   :  { %1120 = vmatpush.bf16.msrb.mxu1 %v1593_v20 }
 0x1e8   :  { %1083 = vmatpush.bf16.msra.mxu2 %v1509_v39 }
 0x1e9   :  { %1109 = vmatpush.bf16.msrb.mxu0 %v1513_v44 }
 0x1ea   :  { %1095 = vmatpush.bf16.msra.mxu3 %v1581_v27 }
 0x1eb   :  { %1121 = vmatpush.bf16.msrb.mxu1 %v1585_v30 }
 0x1ec   :  { %1084 = vmatpush.bf16.msra.mxu2 %v1501_v51 }
 0x1ed   :  { %1110 = vmatpush.bf16.msrb.mxu0 %v1505_v56 }
 0x1ee   :  { %1096 = vmatpush.bf16.msra.mxu3 %v1573_v43 }
 0x1ef   :  { %1122 = vmatpush.bf16.msrb.mxu1 %v1577_v47 }
 0x1f2   :  { %1097 = vmatpush.bf16.msra.mxu3 %v1565_v55 }
 0x1f3   :  { %1123 = vmatpush.bf16.msrb.mxu1 %v1569_v59 }
 0x264   :  { %v741_v31 = vpop.f32.mrf.mxu3 }
 0x265   :  { %v742_v32 = vadd.f32 %v1752_v29, %v741_v31 }
 0x267   :  { %v745_v33 = vmax.f32 %v742_v32, 0.0 }
 0x269   :  { %v746_v34 = vpack.c.bf16 %v745_v33, %v745_v33 }
 0x26b   :  { %857 = vmatmul.bf16.vlgmr.msra.gmra.mxu0 %v746_v34  ;;  %870 = vmatmul.bf16.vlgmr.msra.gmra.mxu1 %v746_v34 }
 0x26c   :  { %v743_v35 = vpop.f32.mrf.mxu3 }
 0x2e8   :  { %v858_v63 = vpop.f32.mrf.mxu0  ;;  %v871_v0 = vpop.f32.mrf.mxu1 }
 0x2e9   :  { %v859_v1 = vadd.f32 %v858_v63, %v765_v61  ;;  %v872_v2 = vadd.f32 %v871_v0, %v766_v62 }
 0x2eb   :  { %v875_v3 = vmax.f32 %v859_v1, 0.0  ;;  %v876_v4 = vmax.f32 %v872_v2, 0.0 }
 0x2ed   :  { %v877_v5 = vpack.c.bf16 %v875_v3, %v875_v3  ;;  %v878_v6 = vpack.c.bf16 %v876_v4, %v876_v4 }
 0x2ef   :  { %1085 = vmatmul.bf16.vlgmr.msra.gmra.mxu2 %v877_v5  ;;  %1098 = vmatmul.bf16.vlgmr.msra.gmra.mxu3 %v878_v6 }
 0x2f0   :  { %1111 = vmatmul.bf16.vlgmr.msrb.gmra.mxu0 %v877_v5  ;;  %1124 = vmatmul.bf16.vlgmr.msrb.gmra.mxu1 %v878_v6  ;;  %v860_v7 = vpop.f32.mrf.mxu0  ;;  %v873_v8 = vpop.f32.mrf.mxu1 }
 0x36d   :  { %v1112_v11 = vpop.f32.mrf.mxu0  ;;  %v1125_v12 = vpop.f32.mrf.mxu1 }
 0x36e   :  { %v1113_v13 = vadd.f32 %v1112_v11, %v914_v10 }
 0x370   :  { %v1126_v15 = vadd.f32 %v1125_v12, %v1113_v13 }
 0x372   :  { %v1130_v16 = vsub.f32 0.0, %v1126_v15  ;;  %v1086_v17 = vpop.f32.mrf.mxu2  ;;  %v1099_v18 = vpop.f32.mrf.mxu3 }
 0x373   :  { %v1087_v19 = vadd.f32 %v1086_v17, %v913_v14 }
 0x374   :  { %v1133_v20 = vmul.f32 1.442695, %v1130_v16 }
 0x375   :  { %v1100_v21 = vadd.f32 %v1099_v18, %v1087_v19  ;;  %v1114_v22 = vpop.f32.mrf.mxu0  ;;  %v1127_v23 = vpop.f32.mrf.mxu1 }
 0x376   :  { %1753 = vpow2.f32 %v1133_v20 }
 0x377   :  { %v1129_v24 = vsub.f32 0.0, %v1100_v21 }
 0x379   :  { %v1131_v25 = vmul.f32 1.442695, %v1129_v24 }
 0x37a   :  { %v1088_v26 = vpop.f32.mrf.mxu2  ;;  %v1101_v27 = vpop.f32.mrf.mxu3 }
 0x37b   :  { %1755 = vpow2.f32 %v1131_v25 }
 0x37c   :  { %v1754_v28 = vpop.eup %1753 }
 0x37d   :  { %v1136_v29 = vadd.f32 1.0, %v1754_v28 }
 0x37f   :  { %1757 = vrcp.f32 %v1136_v29  ;;  %v1163_v35 = vand.u32 2147483648, %v1136_v29  ;;  %v1161_v38 = vand.u32 2147483647, %v1136_v29  ;;  %vm1157_vm1 = vweird.f32 %v1136_v29 }
 0x381   :  { %v1756_v30 = vpop.eup %1755  ;;  %v1164_v41 = vor.u32 1.1754944e-38, %v1163_v35  ;;  %vm1162_vm3 = vcmp.eq.f32.partialorder %v1161_v38, 8.507059e+37 }
 0x382   :  { %v1135_v31 = vadd.f32 1.0, %v1756_v30 }
 0x384   :  { %1759 = vrcp.f32 %v1135_v31  ;;  %v1148_v44 = vand.u32 2147483648, %v1135_v31  ;;  %v1146_v47 = vand.u32 2147483647, %v1135_v31  ;;  %vm1142_vm5 = vweird.f32 %v1135_v31 }
 0x385   :  { %v1758_v32 = vpop.eup %1757 }
 0x386   :  { %v1153_v33 = vmul.f32 %v1758_v32, %v1136_v29  ;;  %vm1158_vm0 = vweird.f32 %v1758_v32  ;;  %v1149_v49 = vor.u32 1.1754944e-38, %v1148_v44  ;;  %vm1147_vm7 = vcmp.eq.f32.partialorder %v1146_v47, 8.507059e+37 }
 0x387   :  { %vm1159_vm2 = vmor %vm1157_vm1, %vm1158_vm0 }
 0x388   :  { %v1154_v34 = vsub.f32 1.0, %v1153_v33 }
 0x38a   :  { %v1760_v36 = vpop.eup %1759  ;;  %v1155_v37 = vmul.f32 %v1758_v32, %v1154_v34 }
 0x38b   :  { %v1138_v39 = vmul.f32 %v1760_v36, %v1135_v31  ;;  %vm1143_vm4 = vweird.f32 %v1760_v36 }
 0x38c   :  { %v1156_v40 = vadd.f32 %v1758_v32, %v1155_v37  ;;  %vm1144_vm6 = vmor %vm1142_vm5, %vm1143_vm4 }
 0x38d   :  { %v1139_v42 = vsub.f32 1.0, %v1138_v39 }
 0x38e   :  { %v1160_v43 = vsel %vm1159_vm2, %v1758_v32, %v1156_v40 }
 0x38f   :  { %v1165_v45 = vsel %vm1162_vm3, %v1164_v41, %v1160_v43  ;;  %v1140_v46 = vmul.f32 %v1760_v36, %v1139_v42 }
 0x390   :  { %1168 = vst [vmem:[%s2136_s13 + $0x8] sm:$0xff] %v1165_v45 }
 0x391   :  { %v1141_v48 = vadd.f32 %v1760_v36, %v1140_v46 }
 0x393   :  { %v1145_v50 = vsel %vm1144_vm6, %v1760_v36, %v1141_v48 }
 0x394   :  { %v1150_v51 = vsel %vm1147_vm7, %v1149_v49, %v1145_v50 }
 0x395   :  { %1167 = vst [vmem:[%s2136_s13] sm:$0xff] %v1150_v51 }
 0x396   :  { %1173 = vsyncpa [#allocation3], 1 }
 0x397   :  { %1174 = vsyncpa [#allocation5], 1 }
 0x398   :  { %1175 = vsyncpa [#allocation8], 1 }
 0x399   :  { %1176 = vsyncpa [#allocation11], 1 }
 0x39a   :  { %1177 = vsyncpa [#allocation14], 1 }

</bundles_post_ra>
